<compile_context>
chip_gen: v6e
topology: v6e:2x2x1
jax: 0.10.0
libtpu: 0.0.40
codegen_flags: <defaults>
</compile_context>

<pallas_src>
import functools

import jax
import jax.numpy as jnp
from jax.experimental import pallas as pl
from jax.experimental.pallas import tpu as pltpu


def _round_up(x, m):
    return ((x + m - 1) // m) * m


def _replica_block_kernel(x1_ref, x2_ref, o_ref):
    # One output block == one replica's column tile: y = (x1*x1)*x2, stored once.
    x1 = x1_ref[...]                       # (tn, 1)
    o_ref[...] = (x1 * x1) * x2_ref[...]   # (tn, col_tile)


def _slice_store_kernel(x1_ref, x2_ref, o_ref, *, c):
    # Fallback for C % 128 != 0: compute y once, write the 4 replicas with
    # static slice stores (no (tn, 4C) temporary, no relayout shuffles).
    x1 = x1_ref[...]                       # (tn, 1)
    y = (x1 * x1) * x2_ref[...]            # (tn, c)
    for k in range(4):
        o_ref[:, k * c:(k + 1) * c] = y


def model_forward(x1, x2):
    n = x1.shape[0]
    c = x2.shape[1]
    out_cols = 4 * c

    dtype = jnp.result_type(x1.dtype, x2.dtype)
    x1 = x1.astype(dtype)
    x2 = x2.astype(dtype)
    itemsize = jnp.dtype(dtype).itemsize
    # Sub-32-bit dtypes pack along sublanes: keep row tiles a multiple of the
    # packed sublane count.
    row_mult = {4: 8, 2: 16, 1: 32}.get(itemsize, 8)

    lane_dense = (c % 128 == 0)
    if lane_dense:
        col_tile = 128
        for cand in (512, 384, 256, 128):
            if c % cand == 0:
                col_tile = cand
                break
        n_col_tiles = c // col_tile
        block_cols = col_tile
    else:
        n_col_tiles = 1
        block_cols = out_cols

    # Row tile: multiple of row_mult, capped at 512 rows and by a ~2 MiB
    # per-output-block budget (double-buffered this stays far under the
    # 16 MiB v5e scoped default and the 64 MiB v7x physical VMEM).
    budget_bytes = 2 * 1024 * 1024
    tn = (budget_bytes // max(1, block_cols * itemsize)) // row_mult * row_mult
    tn = max(row_mult, min(512, tn))
    n_rounded = _round_up(n, row_mult)
    tn = min(tn, n_rounded)
    # Prefer >= 2 row tiles when N allows so both v7x TensorCores stream output
    # even on the single-axis fallback path.
    if n_rounded >= 2 * row_mult and n_rounded // tn < 2:
        tn = _round_up((n_rounded + 1) // 2, row_mult)
    n_pad = _round_up(n, tn)
    grid_rows = n_pad // tn

    x1p = jnp.pad(x1, ((0, n_pad - n), (0, 0))) if n_pad != n else x1

    cost = pl.CostEstimate(
        flops=2 * n_pad * c,
        transcendentals=0,
        bytes_accessed=itemsize * (n_pad + c + n_pad * out_cols),
    )

    if lane_dense:
        nct = n_col_tiles

        def x1_map(i, r, j):
            return (i, 0)

        def x2_map(i, r, j):
            return (0, j)

        def out_map(i, r, j):
            return (i, r * nct + j)

        out = pl.pallas_call(
            _replica_block_kernel,
            out_shape=jax.ShapeDtypeStruct((n_pad, out_cols), dtype),
            grid=(grid_rows, 4, n_col_tiles),
            in_specs=[
                pl.BlockSpec((tn, 1), x1_map),
                pl.BlockSpec((1, col_tile), x2_map),
            ],
            out_specs=pl.BlockSpec((tn, col_tile), out_map),
            compiler_params=pltpu.CompilerParams(
                dimension_semantics=("parallel", "parallel", "parallel"),
                vmem_limit_bytes=32 * 1024 * 1024,
            ),
            cost_estimate=cost,
        )(x1p, x2)
    else:
        out = pl.pallas_call(
            functools.partial(_slice_store_kernel, c=c),
            out_shape=jax.ShapeDtypeStruct((n_pad, out_cols), dtype),
            grid=(grid_rows,),
            in_specs=[
                pl.BlockSpec((tn, 1), lambda i: (i, 0)),
                pl.BlockSpec((1, c), lambda i: (0, 0)),
            ],
            out_specs=pl.BlockSpec((tn, out_cols), lambda i: (i, 0)),
            compiler_params=pltpu.CompilerParams(
                dimension_semantics=("parallel",),
                vmem_limit_bytes=32 * 1024 * 1024,
            ),
            cost_estimate=cost,
        )(x1p, x2)

    return out[:n] if n_pad != n else out


def _reference(x1, x2):
    # Matches the PyTorch forward (torch.cat(v1, 1) on a single tensor treated
    # as identity): out = x1 * cat([x1*x2]*4, axis=1).
    v1 = x1 * x2
    v3 = jnp.concatenate([v1, v1, v1, v1], axis=1)
    return x1 * v3


if __name__ == "__main__":
    key = jax.random.PRNGKey(0)
    k1, k2, k3, k4 = jax.random.split(key, 4)

    # Spec shapes: x1 (2, 1), x2 (1, 4)  -> fallback (slice-store) path.
    x1 = jax.random.normal(k1, (2, 1), dtype=jnp.float32)
    x2 = jax.random.normal(k2, (1, 4), dtype=jnp.float32)
    out = model_forward(x1, x2)
    jax.block_until_ready(out)
    assert out.shape == (2, 16)
    assert jnp.allclose(out, _reference(x1, x2), atol=1e-6), "mismatch (fallback path)"

    # Small lane-dense case exercising the replica-grid fast path.
    x1b = jax.random.normal(k3, (16, 1), dtype=jnp.float32)
    x2b = jax.random.normal(k4, (1, 128), dtype=jnp.float32)
    outb = model_forward(x1b, x2b)
    jax.block_until_ready(outb)
    assert outb.shape == (16, 512)
    assert jnp.allclose(outb, _reference(x1b, x2b), atol=1e-6), "mismatch (fast path)"

    print("KERNEL_OK")
</pallas_src>

<mosaic_0001>
module attributes {stable_mosaic.version = 11 : i64} {
  func.func @_slice_store_kernel(%arg0: i32, %arg1: memref<8x1xf32, #tpu.memory_space<vmem>>, %arg2: memref<1x4xf32, #tpu.memory_space<vmem>>, %arg3: memref<8x16xf32, #tpu.memory_space<vmem>>) attributes {dimension_semantics = [#tpu.dimension_semantics<parallel>], iteration_bounds = array<i64: 1>, scalar_prefetch = 0 : i64, scratch_operands = 0 : i64, tpu.core_type = #tpu.core_type<tc>, window_params = [{transform_indices = @transform_0, window_bounds = array<i64: 8, 1>}, {pipeline_mode = #tpu.pipeline_mode<synchronous>, transform_indices = @transform_1, window_bounds = array<i64: 1, 4>}, {transform_indices = @transform_2, window_bounds = array<i64: 8, 16>}]} {
    %c0 = arith.constant 0 : index
    %c0_0 = arith.constant 0 : index
    %0 = vector.load %arg1[%c0, %c0_0] : memref<8x1xf32, #tpu.memory_space<vmem>>, vector<8x1xf32>
    %1 = arith.mulf %0, %0 : vector<8x1xf32>
    %c0_1 = arith.constant 0 : index
    %c0_2 = arith.constant 0 : index
    %2 = vector.load %arg2[%c0_1, %c0_2] : memref<1x4xf32, #tpu.memory_space<vmem>>, vector<1x4xf32>
    %3 = vector.broadcast %1 : vector<8x1xf32> to vector<8x4xf32>
    %4 = vector.broadcast %2 : vector<1x4xf32> to vector<8x4xf32>
    %5 = arith.mulf %3, %4 : vector<8x4xf32>
    %c0_3 = arith.constant 0 : index
    %c0_4 = arith.constant 0 : index
    %6 = vector.load %arg3[%c0_3, %c0_4] : memref<8x16xf32, #tpu.memory_space<vmem>>, vector<8x4xf32>
    tpu.vector_store %arg3[%c0_3, %c0_4], %5 {strides = array<i32>} : memref<8x16xf32, #tpu.memory_space<vmem>>, vector<8x4xf32>,
    %c0_5 = arith.constant 0 : index
    %c4 = arith.constant 4 : index
    %7 = vector.load %arg3[%c0_5, %c4] : memref<8x16xf32, #tpu.memory_space<vmem>>, vector<8x4xf32>
    tpu.vector_store %arg3[%c0_5, %c4], %5 {strides = array<i32>} : memref<8x16xf32, #tpu.memory_space<vmem>>, vector<8x4xf32>,
    %c0_6 = arith.constant 0 : index
    %c8 = arith.constant 8 : index
    %8 = vector.load %arg3[%c0_6, %c8] : memref<8x16xf32, #tpu.memory_space<vmem>>, vector<8x4xf32>
    tpu.vector_store %arg3[%c0_6, %c8], %5 {strides = array<i32>} : memref<8x16xf32, #tpu.memory_space<vmem>>, vector<8x4xf32>,
    %c0_7 = arith.constant 0 : index
    %c12 = arith.constant 12 : index
    %9 = vector.load %arg3[%c0_7, %c12] : memref<8x16xf32, #tpu.memory_space<vmem>>, vector<8x4xf32>
    tpu.vector_store %arg3[%c0_7, %c12], %5 {strides = array<i32>} : memref<8x16xf32, #tpu.memory_space<vmem>>, vector<8x4xf32>,
    return
  }
  func.func @transform_0(%arg0: i32) -> (i32, i32) {
    %c0_i32 = arith.constant 0 : i32
    %c0_i32_0 = arith.constant 0 : i32
    return %arg0, %c0_i32 : i32, i32
  }
  func.func @transform_1(%arg0: i32) -> (i32, i32) {
    %c0_i32 = arith.constant 0 : i32
    %c0_i32_0 = arith.constant 0 : i32
    %c0_i32_1 = arith.constant 0 : i32
    return %c0_i32, %c0_i32_0 : i32, i32
  }
  func.func @transform_2(%arg0: i32) -> (i32, i32) {
    %c0_i32 = arith.constant 0 : i32
    %c0_i32_0 = arith.constant 0 : i32
    return %arg0, %c0_i32 : i32, i32
  }
}

</mosaic_0001>

<bundles_post_ra>
// kernel: tpu_custom_call.1
= control target key start
LH: loop header
LB: loop body
LE: loop exit
PB: predicated region body
PF: predicated region fallthrough
CT: control target
= control target key end

     0   :  { %v88_v1 = vmov 0   ;;  %s117_s0 = inlined_call_operand.vmem [shape: f32[8,1], index: 0, kind: input, shape index: {}]   ;;  %s118_s1 = inlined_call_operand.vmem [shape: f32[1,4], index: 1, kind: input, shape index: {}]   ;;  %s119_s2 = inlined_call_operand.hbm [shape: f32[8,16], index: 2, kind: output, shape index: {}]  }
   0x1   :  { %v12_v0 = vld [vmem:[%s117_s0] sm:$0xff]  ;;  %65 = vset.pattern.permute.xlu0 %v88_v1 }
   0x2   :  { %v13_v2 = vmul.f32 %v12_v0, %v12_v0 }
   0x3   :  { %7 = vsyncpa [#allocation3], 0  ;;  %v59_v3 = vld [vmem:[%s118_s1] ss:$0 sm:$0xff]  ;;  %vm27_vm0 = vcmask 31744   ;;  %s89_s13 = smov 8  }
   0x4   :  { %17 = vperm.xlu0 %65, %v13_v2   ;;  %s90_s14 = smov 4   ;;  %s91_s15 = smov 12   ;;  %vm33_vm1 = vcmask 64544   ;;  %vm38_vm2 = vcmask 97344   ;;  %vm43_vm3 = vcmask 130144  }
   0x5   :  { %s92_s0 = smov [#allocation2]  }
   0x6   :  { %s51_s16 = sshll.u32 %s92_s0, 4  ;;  %s52_s16 = int_to_ptr.vmem [resolvable:$true] %s51_s16 }
   0x7   :  { %s66_s1 = scalar_lea.vmem %s52_s16, 128  ;;  %p71_p1 = scmp.lt.s32.totalorder %s52_s16, %s52_s16 }
   0x8   :  { %p67_p0 = scmp.ne.s32.totalorder %s52_s16, %s66_s1  ;;  %p72_p2 = scmp.lt.s32.totalorder %s66_s1, %s66_s1 }
   0xa   :  { %p73_p3 = por %p72_p2, %p71_p1 }
   0xc   :  { %p74_p4 = pnand %p73_p3, %p67_p0 }
  0x7f   :  { %v18_v4 = vpop.permute.xlu0 %17 }
  0x80   :  { %v26_v5 = vmul.f32 %v59_v3, %v18_v4 }
  0x82   :  { %35 = vrot.lane.b32.xlu1 %v26_v5, %s89_s13  ;;  %30 = vrot.lane.b32.xlu0 %v26_v5, %s90_s14  ;;  %28 = vst.msk [vmem:[#allocation2] sm:$0xff] %vm27_vm0, %v26_v5 }
  0x86   :  { %40 = vrot.lane.b32.xlu1 %v26_v5, %s91_s15 }
  0xf4   :  { %v36_v6 = vpop.permute.xlu1 %35  ;;  %v31_v7 = vpop.permute.xlu0 %30 }
  0xf5   :  { %34 = vst.msk [vmem:[#allocation2] sm:$0xff] %vm33_vm1, %v31_v7 }
  0xf6   :  { %39 = vst.msk [vmem:[#allocation2] sm:$0xff] %vm38_vm2, %v36_v6 }
  0xf8   :  { %v41_v8 = vpop.permute.xlu1 %40 }
  0xf9   :  { %44 = vst.msk [vmem:[#allocation2] sm:$0xff] %vm43_vm3, %v41_v8 }
  0xfa   :  { %77 = shalt.err (!%p74_p4)
}
  0xfb   :  { %54 = dma.vmem_to_hbm [thread:$0]  %s52_s16, 128, %s119_s2, [#allocation3]  }
  0xfc   :  { %86 = dma.done.wait [#allocation3], 128  }
  0xfd   :  { %87 = vsyncadd [#allocation3], 4294967168 }
  0xfe   :  { %58 = vsyncpa [#allocation3], 1 }

</bundles_post_ra>
